<compile_context>
chip_gen: v7x
topology: tpu7x:2x2x1
jax: 0.10.0
libtpu: 0.0.40
codegen_flags: <defaults>
</compile_context>

<pallas_src>
import functools
import math

import jax
import jax.numpy as jnp
from jax import lax
from jax.experimental import pallas as pl
from jax.experimental.pallas import tpu as pltpu


def _attn_single_block_kernel(q_ref, k_ref, v_ref, o_ref, *, scale_sq):
    """One (Hb, C, T) slab per grid step; full softmax over the key axis."""
    q = q_ref[...] * scale_sq          # [Hb, C, T], input dtype
    k = k_ref[...]                     # [Hb, C, T]
    v = v_ref[...]                     # [Hb, C, T]

    # w[b, t, s] = sum_c q[b, c, t] * k[b, c, s]   (no operand transposes)
    w = lax.dot_general(
        q, k,
        dimension_numbers=(((1,), (1,)), ((0,), (0,))),
        preferred_element_type=jnp.float32)            # [Hb, T, T] f32

    # softmax over the key axis, in f32 (as in the reference).
    w_max = jnp.max(w, axis=-1, keepdims=True)
    w_exp = jnp.exp(w - w_max)
    w_sum = jnp.sum(w_exp, axis=-1, keepdims=True)
    p = (w_exp * pl.reciprocal(w_sum, approx=True)).astype(v.dtype)

    # a[b, c, t] = sum_s v[b, c, s] * p[b, t, s]
    a = lax.dot_general(
        v, p,
        dimension_numbers=(((2,), (2,)), ((0,), (0,))),
        preferred_element_type=jnp.float32)            # [Hb, C, T]
    o_ref[...] = a.astype(o_ref.dtype)


def _attn_flash_kernel(q_ref, k_ref, v_ref, o_ref, m_sc, l_sc, acc_sc, *,
                       scale_sq):
    """KV-tiled online-softmax path: grid = (batch*head blocks, kv blocks)."""
    s = pl.program_id(1)

    @pl.when(s == 0)
    def _():
        m_sc[...] = jnp.full(m_sc.shape, -jnp.inf, dtype=m_sc.dtype)
        l_sc[...] = jnp.zeros(l_sc.shape, dtype=l_sc.dtype)
        acc_sc[...] = jnp.zeros(acc_sc.shape, dtype=acc_sc.dtype)

    q = q_ref[...] * scale_sq          # [Hb, C, T]
    k = k_ref[...]                     # [Hb, C, Tk]
    v = v_ref[...]                     # [Hb, C, Tk]

    # w[b, t, s] = sum_c q[b, c, t] * k[b, c, s]
    w = lax.dot_general(
        q, k,
        dimension_numbers=(((1,), (1,)), ((0,), (0,))),
        preferred_element_type=jnp.float32)            # [Hb, T, Tk] f32

    m_prev = m_sc[...]                                  # [Hb, T, 1]
    m_new = jnp.maximum(m_prev, jnp.max(w, axis=-1, keepdims=True))
    alpha = jnp.exp(m_prev - m_new)
    p = jnp.exp(w - m_new)                              # [Hb, T, Tk] f32
    l_sc[...] = alpha * l_sc[...] + jnp.sum(p, axis=-1, keepdims=True)

    # pv[b, t, c] = sum_s p[b, t, s] * v[b, c, s]
    pv = lax.dot_general(
        p.astype(v.dtype), v,
        dimension_numbers=(((2,), (2,)), ((0,), (0,))),
        preferred_element_type=jnp.float32)             # [Hb, T, C]
    acc_sc[...] = alpha * acc_sc[...] + pv
    m_sc[...] = m_new

    @pl.when(s == pl.num_programs(1) - 1)
    def _():
        out = acc_sc[...] * pl.reciprocal(l_sc[...], approx=True)   # [Hb, T, C]
        # single small transpose per output block, amortized over all KV steps
        o_ref[...] = jnp.swapaxes(out, 1, 2).astype(o_ref.dtype)


def _pick_head_block(B, ch, length, tk, itemsize, use_flash):
    """Largest divisor of B under a VMEM budget, keeping >=2 grid steps."""
    io_bytes = 2 * itemsize * ch * (2 * length + 2 * tk)   # q,o (T) + k,v (tk), 2x buffered
    score_bytes = 2 * 4 * length * tk                      # f32 scores + probs
    acc_bytes = 4 * length * (ch + 2 * 128) if use_flash else 0  # acc + padded m/l
    per_head = max(1, io_bytes + score_bytes + acc_bytes)
    budget = 20 * 1024 * 1024
    cap = min(16, max(1, budget // per_head), max(1, B // 2))
    cap = int(max(1, min(cap, B)))
    return max(d for d in range(1, cap + 1) if B % d == 0)


def qkv_attention_pallas(qkv, n_heads, *, head_block=None, kv_block=None):
    """Pallas equivalent of QKVAttention.forward.

    :param qkv: [N, 3 * H * C, T] array.
    :return: [N, H * C, T] array.
    """
    bs, width, length = qkv.shape
    assert width % (3 * n_heads) == 0
    ch = width // (3 * n_heads)
    scale_sq = 1.0 / math.sqrt(ch)      # (1/ch**0.25)**2, folded into q only

    q, k, v = jnp.split(qkv, 3, axis=1)                   # each [N, H*C, T]
    B = bs * n_heads
    q = q.reshape(B, ch, length)
    k = k.reshape(B, ch, length)
    v = v.reshape(B, ch, length)

    itemsize = jnp.dtype(qkv.dtype).itemsize

    # Decide whether to tile the key axis (flash path) for large T.
    if kv_block is None and length % 128 == 0 and (length * length * 4) > (2 << 20):
        kv_block = 512
        while length % kv_block:
            kv_block //= 2
    use_flash = kv_block is not None and kv_block < length
    if use_flash:
        assert length % kv_block == 0

    tk = kv_block if use_flash else length
    if head_block is None:
        head_block = _pick_head_block(B, ch, length, tk, itemsize, use_flash)
    hb = head_block
    assert B % hb == 0

    compiler_params = pltpu.CompilerParams(
        dimension_semantics=("parallel", "arbitrary") if use_flash else ("parallel",),
        vmem_limit_bytes=48 * 1024 * 1024,
    )

    if use_flash:
        q_spec = pl.BlockSpec((hb, ch, length), lambda b, s: (b, 0, 0))
        kv_spec = pl.BlockSpec((hb, ch, kv_block), lambda b, s: (b, 0, s))
        o_spec = pl.BlockSpec((hb, ch, length), lambda b, s: (b, 0, 0))
        out = pl.pallas_call(
            functools.partial(_attn_flash_kernel, scale_sq=scale_sq),
            out_shape=jax.ShapeDtypeStruct((B, ch, length), qkv.dtype),
            grid_spec=pltpu.PrefetchScalarGridSpec(
                num_scalar_prefetch=0,
                grid=(B // hb, length // kv_block),
                in_specs=[q_spec, kv_spec, kv_spec],
                out_specs=o_spec,
                scratch_shapes=[
                    pltpu.VMEM((hb, length, 1), jnp.float32),   # m (running max)
                    pltpu.VMEM((hb, length, 1), jnp.float32),   # l (running denom)
                    pltpu.VMEM((hb, length, ch), jnp.float32),  # acc (running PV)
                ],
            ),
            compiler_params=compiler_params,
        )(q, k, v)
    else:
        blk = pl.BlockSpec((hb, ch, length), lambda b: (b, 0, 0))
        out = pl.pallas_call(
            functools.partial(_attn_single_block_kernel, scale_sq=scale_sq),
            out_shape=jax.ShapeDtypeStruct((B, ch, length), qkv.dtype),
            grid_spec=pltpu.PrefetchScalarGridSpec(
                num_scalar_prefetch=0,
                grid=(B // hb,),
                in_specs=[blk, blk, blk],
                out_specs=blk,
            ),
            compiler_params=compiler_params,
        )(q, k, v)

    return out.reshape(bs, n_heads * ch, length)


def qkv_attention_reference(qkv, n_heads):
    """Pure-JAX reference mirroring the PyTorch module exactly."""
    bs, width, length = qkv.shape
    ch = width // (3 * n_heads)
    q, k, v = jnp.split(qkv, 3, axis=1)
    scale = 1.0 / math.sqrt(math.sqrt(ch))
    q = (q * scale).reshape(bs * n_heads, ch, length)
    k = (k * scale).reshape(bs * n_heads, ch, length)
    v = v.reshape(bs * n_heads, ch, length)
    weight = jnp.einsum("bct,bcs->bts", q, k)
    weight = jax.nn.softmax(weight.astype(jnp.float32), axis=-1).astype(weight.dtype)
    a = jnp.einsum("bts,bcs->bct", weight, v)
    return a.reshape(bs, -1, length)


if __name__ == "__main__":
    key = jax.random.PRNGKey(0)
    k1, k2 = jax.random.split(key)

    # Case 1: small shapes, single-block path. N=2, H=2, C=16, T=8 -> width 96.
    N, H, C, T = 2, 2, 16, 8
    qkv1 = jax.random.normal(k1, (N, 3 * H * C, T), dtype=jnp.float32)
    out1 = jax.block_until_ready(qkv_attention_pallas(qkv1, n_heads=H))
    ref1 = qkv_attention_reference(qkv1, n_heads=H)
    assert out1.shape == (N, H * C, T), out1.shape
    assert jnp.allclose(out1, ref1, atol=2e-3, rtol=2e-3), "single-block mismatch"

    # Case 2: exercise the KV-tiled online-softmax (flash) path at modest size.
    N, H, C, T = 1, 2, 32, 256
    qkv2 = jax.random.normal(k2, (N, 3 * H * C, T), dtype=jnp.float32)
    out2 = jax.block_until_ready(
        qkv_attention_pallas(qkv2, n_heads=H, kv_block=128))
    ref2 = qkv_attention_reference(qkv2, n_heads=H)
    assert out2.shape == (N, H * C, T), out2.shape
    assert jnp.allclose(out2, ref2, atol=2e-3, rtol=2e-3), "flash path mismatch"

    print("KERNEL_OK")
</pallas_src>

<mosaic_0001>
module attributes {stable_mosaic.version = 11 : i64} {
  func.func @_attn_single_block_kernel(%arg0: i32, %arg1: memref<2x16x8xf32, #tpu.memory_space<vmem>>, %arg2: memref<2x16x8xf32, #tpu.memory_space<vmem>>, %arg3: memref<2x16x8xf32, #tpu.memory_space<vmem>>, %arg4: memref<2x16x8xf32, #tpu.memory_space<vmem>>) attributes {dimension_semantics = [#tpu.dimension_semantics<parallel>], iteration_bounds = array<i64: 2>, scalar_prefetch = 0 : i64, scratch_operands = 0 : i64, tpu.core_type = #tpu.core_type<tc>, window_params = [{transform_indices = @transform_0, window_bounds = array<i64: 2, 16, 8>}, {transform_indices = @transform_1, window_bounds = array<i64: 2, 16, 8>}, {transform_indices = @transform_2, window_bounds = array<i64: 2, 16, 8>}, {transform_indices = @transform_3, window_bounds = array<i64: 2, 16, 8>}]} {
    %c0 = arith.constant 0 : index
    %c0_0 = arith.constant 0 : index
    %c0_1 = arith.constant 0 : index
    %0 = vector.load %arg1[%c0, %c0_0, %c0_1] : memref<2x16x8xf32, #tpu.memory_space<vmem>>, vector<2x16x8xf32>
    %cst = arith.constant 2.500000e-01 : f32
    %1 = vector.broadcast %cst : f32 to vector<2x16x8xf32>
    %2 = arith.mulf %0, %1 : vector<2x16x8xf32>
    %c0_2 = arith.constant 0 : index
    %c0_3 = arith.constant 0 : index
    %c0_4 = arith.constant 0 : index
    %3 = vector.load %arg2[%c0_2, %c0_3, %c0_4] : memref<2x16x8xf32, #tpu.memory_space<vmem>>, vector<2x16x8xf32>
    %c0_5 = arith.constant 0 : index
    %c0_6 = arith.constant 0 : index
    %c0_7 = arith.constant 0 : index
    %4 = vector.load %arg3[%c0_5, %c0_6, %c0_7] : memref<2x16x8xf32, #tpu.memory_space<vmem>>, vector<2x16x8xf32>
    %cst_8 = arith.constant dense<0.000000e+00> : vector<2x8x8xf32>
    %5 = tpu.matmul %2, %3, %cst_8 {dimension_numbers = #tpu.dot_dimension_numbers<[1], [1], [2], [2], [0, 0, 0, 2, 1, 2], [0], [0]>} : vector<2x16x8xf32>, vector<2x16x8xf32>, vector<2x8x8xf32> -> vector<2x8x8xf32>
    %cst_9 = arith.constant dense<0xFF800000> : vector<2x8xf32>
    %6 = vector.multi_reduction <maximumf>, %5, %cst_9 [2] : vector<2x8x8xf32> to vector<2x8xf32>
    %7 = vector.shape_cast %6 : vector<2x8xf32> to vector<2x8x1xf32>
    %8 = vector.broadcast %7 : vector<2x8x1xf32> to vector<2x8x8xf32>
    %9 = arith.subf %5, %8 : vector<2x8x8xf32>
    %10 = math.exp %9 : vector<2x8x8xf32>
    %cst_10 = arith.constant dense<0.000000e+00> : vector<2x8xf32>
    %11 = vector.multi_reduction <add>, %10, %cst_10 [2] : vector<2x8x8xf32> to vector<2x8xf32>
    %12 = vector.shape_cast %11 : vector<2x8xf32> to vector<2x8x1xf32>
    %13 = tpu.reciprocal %12 {approx = true} : vector<2x8x1xf32> -> vector<2x8x1xf32>
    %14 = vector.broadcast %13 : vector<2x8x1xf32> to vector<2x8x8xf32>
    %15 = arith.mulf %10, %14 : vector<2x8x8xf32>
    %cst_11 = arith.constant dense<0.000000e+00> : vector<2x16x8xf32>
    %16 = tpu.matmul %4, %15, %cst_11 {dimension_numbers = #tpu.dot_dimension_numbers<[2], [2], [1], [1], [0, 0, 0, 1, 1, 1], [0], [0]>} : vector<2x16x8xf32>, vector<2x8x8xf32>, vector<2x16x8xf32> -> vector<2x16x8xf32>
    %c0_12 = arith.constant 0 : index
    %c0_13 = arith.constant 0 : index
    %c0_14 = arith.constant 0 : index
    %17 = vector.load %arg4[%c0_12, %c0_13, %c0_14] : memref<2x16x8xf32, #tpu.memory_space<vmem>>, vector<2x16x8xf32>
    tpu.vector_store %arg4[%c0_12, %c0_13, %c0_14], %16 {strides = array<i32>} : memref<2x16x8xf32, #tpu.memory_space<vmem>>, vector<2x16x8xf32>,
    return
  }
  func.func @transform_0(%arg0: i32) -> (i32, i32, i32) {
    %c0_i32 = arith.constant 0 : i32
    %c0_i32_0 = arith.constant 0 : i32
    %c0_i32_1 = arith.constant 0 : i32
    return %arg0, %c0_i32, %c0_i32_0 : i32, i32, i32
  }
  func.func @transform_1(%arg0: i32) -> (i32, i32, i32) {
    %c0_i32 = arith.constant 0 : i32
    %c0_i32_0 = arith.constant 0 : i32
    %c0_i32_1 = arith.constant 0 : i32
    return %arg0, %c0_i32, %c0_i32_0 : i32, i32, i32
  }
  func.func @transform_2(%arg0: i32) -> (i32, i32, i32) {
    %c0_i32 = arith.constant 0 : i32
    %c0_i32_0 = arith.constant 0 : i32
    %c0_i32_1 = arith.constant 0 : i32
    return %arg0, %c0_i32, %c0_i32_0 : i32, i32, i32
  }
  func.func @transform_3(%arg0: i32) -> (i32, i32, i32) {
    %c0_i32 = arith.constant 0 : i32
    %c0_i32_0 = arith.constant 0 : i32
    %c0_i32_1 = arith.constant 0 : i32
    return %arg0, %c0_i32, %c0_i32_0 : i32, i32, i32
  }
}

</mosaic_0001>

<bundles_post_ra>
// kernel: tpu_custom_call.1
= control target key start
LH: loop header
LB: loop body
LE: loop exit
PB: predicated region body
PF: predicated region fallthrough
CT: control target
= control target key end

     0   :  { %s856_s12 = smov 0   ;;  %s901_s0 = inlined_call_operand.vmem [shape: f32[4,16,8], index: 0, kind: input, shape index: {}]   ;;  %s902_s1 = inlined_call_operand.vmem [shape: f32[4,16,8], index: 1, kind: input, shape index: {}]   ;;  %s903_s2 = inlined_call_operand.vmem [shape: f32[4,16,8], index: 2, kind: input, shape index: {}]   ;;  %s904_s3 = inlined_call_operand.vmem [shape: f32[4,16,8], index: 3, kind: output, shape index: {}]  }
   0x1 LB: > { %s733_s13 = sadd.s32 4294967295, %s831_s12   ;;  %p737_p0 = scmp.ge.s32.totalorder %s831_s12, 1  ;;  %s831_s12 = sphi %s856_s12, %s13_s12  }
   0x2   : > { %p163_p1 = scmp.lt.s32.totalorder %s831_s12, 3 }
   0x4   : > { %p164_p2 = pnand %p737_p0, %p163_p1 }
   0x5   : > { %s738_s14 = sshll.u32 (!%p164_p2), %s733_s13, 1  ;;  %v833_v0 = vmov (!%p164_p2), 0.0|0.0   ;;  %vm834_vm0 = vmmov (!%p164_p2), 0   ;;  %v835_v1 = vmov (!%p164_p2), 0.0   ;;  %vm277_vm1 = vcmask (!%p164_p2), 130048  }
   0x6   : > { %167 = sbr.rel (%p164_p2) target bundleno = 896 (0x380), region = 32  ;;  %p202_p3 = scmp.lt.s32.totalorder (!%p164_p2), %s738_s14, 3  ;;  %800 = vmatprep.subr.bf16.mxu0 (!%p164_p2), %v833_v0  ;;  %803 = vmatprep.subr.bf16.mxu1 (!%p164_p2), %v833_v0  ;;  %vm456_vm2 = vcmask (!%p164_p2), 64512  }
   0x7   : > { %780 = vmatprep.mubr.msk.f32.mxu0 (!%p164_p2), %vm834_vm0, %v835_v1  ;;  %787 = vmatprep.mubr.msk.f32.mxu1 (!%p164_p2), %vm834_vm0, %v835_v1 }
   0xd   : > { %s906_s14 = smov (!%p202_p3, %s738_s14), 3 }
   0xe   : > { %s864_s15 = sshll.u32 %s906_s14, 4 }
   0xf   : > { %s206_s18 = scalar_lea.vmem %s901_s0, %s864_s15  ;;  %s213_s21 = scalar_lea.vmem %s902_s1, %s864_s15 }
  0x10   : > { %v231_v2 = vld [vmem:[%s206_s18 + $0x10] sm:$0xff]  ;;  %v229_v3 = vld [vmem:[%s206_s18] sm:$0xff]  ;;  %v232_v4 = vld [vmem:[%s206_s18 + $0x18] sm:$0xff]  ;;  %s220_s24 = scalar_lea.vmem %s903_s2, %s864_s15  ;;  %s227_s27 = scalar_lea.vmem %s904_s3, %s864_s15 }
  0x11   : > { %v235_v5 = vmul.f32 0.25, %v231_v2  ;;  %v233_v6 = vmul.f32 0.25, %v229_v3  ;;  %v230_v7 = vld [vmem:[%s206_s18 + $0x8] sm:$0xff]  ;;  %v237_v8 = vld [vmem:[%s213_s21] sm:$0xff]  ;;  %v239_v11 = vld [vmem:[%s213_s21 + $0x10] sm:$0xff]  ;;  %v236_v13 = vmul.f32 0.25, %v232_v4 }
  0x12   : > { %v238_v9 = vld [vmem:[%s213_s21 + $0x8] sm:$0xff]  ;;  %v240_v12 = vld [vmem:[%s213_s21 + $0x18] sm:$0xff]  ;;  %v234_v14 = vmul.f32 0.25, %v230_v7  ;;  %v241_v34 = vld [vmem:[%s220_s24] sm:$0xff] }
  0x13   : > { %v801_v10 = vpack.c.bf16 %v238_v9, %v237_v8  ;;  %351 = vxpose.xlu1.b32.start [1/2] (short) (narrow) %v235_v5, 8  ;;  %245 = vxpose.xlu0.b32.start [1/2] (short) (narrow) %v233_v6, 8  ;;  %v804_v15 = vpack.c.bf16 %v240_v12, %v239_v11  ;;  %v243_v35 = vld [vmem:[%s220_s24 + $0x10] sm:$0xff]  ;;  %v242_v41 = vld [vmem:[%s220_s24 + $0x8] sm:$0xff]  ;;  %v244_v43 = vld [vmem:[%s220_s24 + $0x18] sm:$0xff] }
  0x15   : > { %802 = vmatpush3.bf16.msra.mxu0 %v801_v10  ;;  %805 = vmatpush3.bf16.msra.mxu1 %v804_v15 }
  0x17   : > { %352 = vxpose.xlu1.b32.end [2/2] (short) (narrow) %v236_v13, 8  ;;  %246 = vxpose.xlu0.b32.end [2/2] (short) (narrow) %v234_v14, 8 }
  0x93   : > { %v367_v16 = vpop.trf.xlu1  ;;  %v261_v17 = vpop.trf.xlu0 }
  0x94   : > { %781 = vmatmul.mubr.msk.f32.vlgmr.msra.gmra.mrb[0].mxu0 %vm277_vm1, %v261_v17  ;;  %788 = vmatmul.mubr.msk.f32.vlgmr.msra.gmra.mrb[0].mxu1 %vm277_vm1, %v367_v16 }
  0x95   : > { %792 = vmatprep.mubr.msk.f32.mxu0 %vm456_vm2, %v241_v34  ;;  %797 = vmatprep.mubr.msk.f32.mxu1 %vm456_vm2, %v243_v35 }
 0x167   : > { %v347_v18 = vpop.f32.mrb[0].mxu0  ;;  %v452_v19 = vpop.f32.mrb[0].mxu1 }
 0x168   : > { %v782_v20 = vpop.f32.mrb[1].mxu0  ;;  %v460_v21 = vsel %vm456_vm2, %v452_v19, -inf  ;;  %v457_v22 = vsel %vm456_vm2, %v347_v18, -inf  ;;  %v789_v23 = vpop.f32.mrb[1].mxu1 }
 0x169   : > { %461 = vmax.xlane.f32.xlu1 %v460_v21  ;;  %458 = vmax.xlane.f32.xlu0 %v457_v22 }
 0x1f6   : > { %v462_v24 = vpop.xlane.xlu1 %461  ;;  %v459_v25 = vpop.xlane.xlu0 %458 }
 0x1f7   : > { %v464_v26 = vsub.f32 %v452_v19, %v462_v24  ;;  %v463_v27 = vsub.f32 %v347_v18, %v459_v25 }
 0x1f9   : > { %v465_v28 = vmul.f32 1.442695, %v463_v27  ;;  %v467_v29 = vmul.f32 1.442695, %v464_v26 }
 0x1fb   : > { %817 = vpow2.f32 %v465_v28 }
 0x1fc   : > { %819 = vpow2.f32 %v467_v29 }
 0x205   : > { %v818_v30 = vpop.eup %817 }
 0x206   : > { %v469_v31 = vsel %vm456_vm2, %v818_v30, 0.0  ;;  %v820_v32 = vpop.eup %819 }
 0x207   : > { %470 = vadd.xlane.f32.xlu1 %v469_v31  ;;  %v472_v33 = vsel %vm456_vm2, %v820_v32, 0.0 }
 0x20b   : > { %473 = vadd.xlane.f32.xlu1 %v472_v33 }
 0x294   : > { %v471_v36 = vpop.xlane.xlu1 %470 }
 0x295   : > { %821 = vrcp.f32 %v471_v36 }
 0x298   : > { %v474_v37 = vpop.xlane.xlu1 %473 }
 0x299   : > { %823 = vrcp.f32 %v474_v37 }
 0x29f   : > { %v822_v38 = vpop.eup %821 }
 0x2a0   : > { %v477_v39 = vmul.f32 %v822_v38, %v818_v30 }
 0x2a2   : > { %790 = vmatprep.subr.msk.mxu0 %vm456_vm2, %v477_v39 }
 0x2a3   : > { %v824_v40 = vpop.eup %823  ;;  %791 = vmatpush3.xpose.msk.msra.mxu0 %vm456_vm2, %v477_v39 }
 0x2a4   : > { %v478_v42 = vmul.f32 %v824_v40, %v820_v32 }
 0x2a6   : > { %795 = vmatprep.subr.msk.mxu1 %vm456_vm2, %v478_v42  ;;  %793 = vmatmul.mubr.msk.f32.vlgmr.msra.gmra.mrb[2].mxu0 %vm456_vm2, %v242_v41 }
 0x2a7   : > { %796 = vmatpush3.xpose.msk.msra.mxu1 %vm456_vm2, %v478_v42 }
 0x2aa   : > { %798 = vmatmul.mubr.msk.f32.vlgmr.msra.gmra.mrb[2].mxu1 %vm456_vm2, %v244_v43 }
 0x379   : > { %v794_v44 = vpop.f32.mrb[2].mxu0 }
 0x37a   : > { %648 = vst.msk [vmem:[%s227_s27 + $0x8] sm:$0xff] %vm456_vm2, %v794_v44  ;;  %v554_v45 = vpop.f32.mrb[3].mxu0 }
 0x37b   : > { %647 = vst.msk [vmem:[%s227_s27] sm:$0xff] %vm456_vm2, %v554_v45 }
 0x37d   : > { %v799_v46 = vpop.f32.mrb[2].mxu1 }
 0x37e   : > { %650 = vst.msk [vmem:[%s227_s27 + $0x18] sm:$0xff] %vm456_vm2, %v799_v46  ;;  %v638_v47 = vpop.f32.mrb[3].mxu1 }
 0x37f   : > { %649 = vst.msk [vmem:[%s227_s27 + $0x10] sm:$0xff] %vm456_vm2, %v638_v47 }
 0x380 PF: > { %s13_s12 = sadd.s32 1, %s831_s12  }
 0x381   : > { %p10_p4 = scmp.ge.s32.totalorder %s13_s12, 4  }
 0x383   :  { %12 = sbr.rel (!%p10_p4) target bundleno = 1 (0x1), region = 68 }

</bundles_post_ra>
